<compile_context>
chip_gen: v7x
topology: tpu7x:2x2x1
jax: 0.10.0
libtpu: 0.0.40
codegen_flags: <defaults>
</compile_context>

<pallas_src>
import jax
import jax.numpy as jnp
from jax.experimental import pallas as pl
from jax.experimental.pallas import tpu as pltpu


def att3_kernel(v_ref, q_ref, wv_ref, bv_ref, wq_ref, bq_ref,
                w2_ref, b2_ref, wl_ref, bl_ref, out_ref):
    """One grid step = block_b batch elements = block_b*K rows."""
    TB, K = out_ref.shape            # (block_b, K)
    H = wv_ref.shape[1]

    # --- v branch: [TB*K, v_dim] @ [v_dim, H] on the MXU (bf16 in, f32 acc) ---
    vh = jnp.dot(v_ref[...], wv_ref[...], preferred_element_type=jnp.float32)
    vh = jnp.maximum(vh + bv_ref[...], 0.0)                    # [TB*K, H] f32

    # --- q branch: computed once per batch row (no K-fold HBM broadcast) ---
    qh = jnp.dot(q_ref[...], wq_ref[...], preferred_element_type=jnp.float32)
    qh = jnp.maximum(qh + bq_ref[...], 0.0)                    # [TB, H] f32

    # joint = v_proj * q_proj, broadcasting q over the K objects in-register.
    joint = vh.reshape(TB, K, H) * qh[:, None, :]              # [TB, K, H]
    joint = joint.reshape(TB * K, H)

    # --- nonlinear layer: [TB*K, H] @ [H, H] ---
    jr = jnp.dot(joint.astype(jnp.bfloat16), w2_ref[...],
                 preferred_element_type=jnp.float32)
    jr = jnp.maximum(jr + b2_ref[...], 0.0)                    # [TB*K, H] f32

    # --- final [H, 1] linear as VPU multiply + lane reduce (MXU stays free) ---
    logits = jnp.sum(jr.reshape(TB, K, H) * wl_ref[...], axis=-1)   # [TB, K]
    logits = logits + bl_ref[...]        # constant shift; kept for fidelity

    # --- stable softmax over K (K on lanes) ---
    m = jnp.max(logits, axis=-1, keepdims=True)
    e = jnp.exp(logits - m)
    s = jnp.sum(e, axis=-1, keepdims=True)
    out_ref[...] = e * pl.reciprocal(s, approx=True)


def att3(v, q, params, *, block_b=16):
    """v: [B, K, v_dim] f32, q: [B, q_dim] f32 -> attention weights [B, K, 1].

    block_b (multiple of 8) batch elements per grid step => block_b*K matmul
    rows per tile (128 rows at K=8 with the default).
    """
    B, K, v_dim = v.shape
    q_dim = q.shape[1]
    H = params["wv"].shape[1]

    # Pad batch up to a multiple of block_b (padded rows are sliced off below).
    B_pad = ((B + block_b - 1) // block_b) * block_b
    if B_pad != B:
        v = jnp.pad(v, ((0, B_pad - B), (0, 0), (0, 0)))
        q = jnp.pad(q, ((0, B_pad - B), (0, 0)))

    rows = block_b * K
    v2 = v.reshape(B_pad * K, v_dim).astype(jnp.bfloat16)   # rows on sublanes
    q2 = q.astype(jnp.bfloat16)

    wv = params["wv"].astype(jnp.bfloat16)
    wq = params["wq"].astype(jnp.bfloat16)
    w2 = params["w2"].astype(jnp.bfloat16)
    bv = params["bv"].astype(jnp.float32)
    bq = params["bq"].astype(jnp.float32)
    b2 = params["b2"].astype(jnp.float32)
    wl_row = params["wl"].reshape(1, H).astype(jnp.float32)  # row form for VPU
    bl = params["bl"].reshape(1, 1).astype(jnp.float32)

    def const2d(shape):
        return pl.BlockSpec(shape, lambda i: (0, 0))

    out = pl.pallas_call(
        att3_kernel,
        out_shape=jax.ShapeDtypeStruct((B_pad, K), jnp.float32),
        grid_spec=pltpu.PrefetchScalarGridSpec(
            num_scalar_prefetch=0,
            grid=(B_pad // block_b,),
            in_specs=[
                pl.BlockSpec((rows, v_dim), lambda i: (i, 0)),      # v rows
                pl.BlockSpec((block_b, q_dim), lambda i: (i, 0)),   # q rows
                const2d((v_dim, H)), const2d((1, H)),               # Wv, bv
                const2d((q_dim, H)), const2d((1, H)),               # Wq, bq
                const2d((H, H)),     const2d((1, H)),               # W2, b2
                const2d((1, H)),     const2d((1, 1)),               # wl, bl
            ],
            out_specs=pl.BlockSpec((block_b, K), lambda i: (i, 0)),
        ),
        compiler_params=pltpu.CompilerParams(
            dimension_semantics=("parallel",),     # shards row tiles on v7x TCs
            vmem_limit_bytes=32 * 1024 * 1024,     # explicit budget (v7x-safe)
        ),
    )(v2, q2, wv, bv, wq, bq, w2, b2, wl_row, bl)

    return out[:B, :, None]                                   # [B, K, 1]


# -------------------------- host-side parameter glue --------------------------

def _weight_norm_none(v_raw, g):
    # torch weight_norm with dim=None: W = g * V / ||V||_F
    return g * v_raw / jnp.sqrt(jnp.sum(v_raw * v_raw))


def make_params(key, v_dim, q_dim, num_hid):
    ks = jax.random.split(key, 8)
    scale = 0.1

    def lin(kw, kb, din, dout):
        v_raw = scale * jax.random.normal(kw, (din, dout), jnp.float32)
        g = jnp.sqrt(jnp.float32(din))          # deterministic weight-norm gain
        w = _weight_norm_none(v_raw, g)
        b = scale * jax.random.normal(kb, (1, dout), jnp.float32)
        return w, b

    wv, bv = lin(ks[0], ks[1], v_dim, num_hid)
    wq, bq = lin(ks[2], ks[3], q_dim, num_hid)
    w2, b2 = lin(ks[4], ks[5], num_hid, num_hid)
    wl, bl = lin(ks[6], ks[7], num_hid, 1)
    return dict(wv=wv, bv=bv, wq=wq, bq=bq, w2=w2, b2=b2, wl=wl, bl=bl)


def att3_ref(v, q, p):
    """Pure-JAX (f32) reference mirroring the PyTorch forward."""
    vh = jnp.maximum(v @ p["wv"] + p["bv"], 0.0)               # [B, K, H]
    qh = jnp.maximum(q @ p["wq"] + p["bq"], 0.0)               # [B, H]
    joint = vh * qh[:, None, :]
    jr = jnp.maximum(joint @ p["w2"] + p["b2"], 0.0)
    logits = jr @ p["wl"] + p["bl"]                            # [B, K, 1]
    return jax.nn.softmax(logits, axis=1)


if __name__ == "__main__":
    B, K, V_DIM, Q_DIM, NUM_HID = 2, 8, 16, 32, 32

    key = jax.random.PRNGKey(0)
    kv, kq, kp = jax.random.split(key, 3)
    v = jax.random.normal(kv, (B, K, V_DIM), jnp.float32)
    q = jax.random.normal(kq, (B, Q_DIM), jnp.float32)
    params = make_params(kp, V_DIM, Q_DIM, NUM_HID)

    w = att3(v, q, params)
    w = jax.block_until_ready(w)

    w_ref = att3_ref(v, q, params)
    assert w.shape == (B, K, 1)
    # bf16 matmul operands + approximate reciprocal => relaxed tolerances.
    assert jnp.allclose(w, w_ref, atol=3e-2, rtol=5e-2), "mismatch vs reference"
    assert jnp.allclose(jnp.sum(w, axis=1), 1.0, atol=5e-3), "softmax not normalized"

    print("KERNEL_OK")
</pallas_src>

<mosaic_0001>
module attributes {stable_mosaic.version = 11 : i64} {
  func.func @att3_kernel(%arg0: i32, %arg1: memref<128x16xbf16, #tpu.memory_space<vmem>>, %arg2: memref<16x32xbf16, #tpu.memory_space<vmem>>, %arg3: memref<16x32xbf16, #tpu.memory_space<vmem>>, %arg4: memref<1x32xf32, #tpu.memory_space<vmem>>, %arg5: memref<32x32xbf16, #tpu.memory_space<vmem>>, %arg6: memref<1x32xf32, #tpu.memory_space<vmem>>, %arg7: memref<32x32xbf16, #tpu.memory_space<vmem>>, %arg8: memref<1x32xf32, #tpu.memory_space<vmem>>, %arg9: memref<1x32xf32, #tpu.memory_space<vmem>>, %arg10: memref<1x1xf32, #tpu.memory_space<vmem>>, %arg11: memref<16x8xf32, #tpu.memory_space<vmem>>) attributes {dimension_semantics = [#tpu.dimension_semantics<parallel>], iteration_bounds = array<i64: 1>, scalar_prefetch = 0 : i64, scratch_operands = 0 : i64, tpu.core_type = #tpu.core_type<tc>, window_params = [{transform_indices = @transform_0, window_bounds = array<i64: 128, 16>}, {transform_indices = @transform_1, window_bounds = array<i64: 16, 32>}, {pipeline_mode = #tpu.pipeline_mode<synchronous>, transform_indices = @transform_2, window_bounds = array<i64: 16, 32>}, {pipeline_mode = #tpu.pipeline_mode<synchronous>, transform_indices = @transform_3, window_bounds = array<i64: 1, 32>}, {pipeline_mode = #tpu.pipeline_mode<synchronous>, transform_indices = @transform_4, window_bounds = array<i64: 32, 32>}, {pipeline_mode = #tpu.pipeline_mode<synchronous>, transform_indices = @transform_5, window_bounds = array<i64: 1, 32>}, {pipeline_mode = #tpu.pipeline_mode<synchronous>, transform_indices = @transform_6, window_bounds = array<i64: 32, 32>}, {pipeline_mode = #tpu.pipeline_mode<synchronous>, transform_indices = @transform_7, window_bounds = array<i64: 1, 32>}, {pipeline_mode = #tpu.pipeline_mode<synchronous>, transform_indices = @transform_8, window_bounds = array<i64: 1, 32>}, {pipeline_mode = #tpu.pipeline_mode<synchronous>, transform_indices = @transform_9, window_bounds = array<i64: 1, 1>}, {transform_indices = @transform_10, window_bounds = array<i64: 16, 8>}]} {
    %c0 = arith.constant 0 : index
    %c0_0 = arith.constant 0 : index
    %0 = vector.load %arg1[%c0, %c0_0] : memref<128x16xbf16, #tpu.memory_space<vmem>>, vector<128x16xbf16>
    %c0_1 = arith.constant 0 : index
    %c0_2 = arith.constant 0 : index
    %1 = vector.load %arg3[%c0_1, %c0_2] : memref<16x32xbf16, #tpu.memory_space<vmem>>, vector<16x32xbf16>
    %cst = arith.constant dense<0.000000e+00> : vector<128x32xf32>
    %2 = tpu.matmul %0, %1, %cst {dimension_numbers = #tpu.dot_dimension_numbers<[1], [0], [0], [1], [0, 0, 1, 1], [], []>} : vector<128x16xbf16>, vector<16x32xbf16>, vector<128x32xf32> -> vector<128x32xf32>
    %c0_3 = arith.constant 0 : index
    %c0_4 = arith.constant 0 : index
    %3 = vector.load %arg4[%c0_3, %c0_4] : memref<1x32xf32, #tpu.memory_space<vmem>>, vector<1x32xf32>
    %4 = vector.broadcast %3 : vector<1x32xf32> to vector<128x32xf32>
    %5 = arith.addf %2, %4 : vector<128x32xf32>
    %cst_5 = arith.constant 0.000000e+00 : f32
    %6 = vector.broadcast %cst_5 : f32 to vector<128x32xf32>
    %7 = arith.maximumf %5, %6 : vector<128x32xf32>
    %c0_6 = arith.constant 0 : index
    %c0_7 = arith.constant 0 : index
    %8 = vector.load %arg2[%c0_6, %c0_7] : memref<16x32xbf16, #tpu.memory_space<vmem>>, vector<16x32xbf16>
    %c0_8 = arith.constant 0 : index
    %c0_9 = arith.constant 0 : index
    %9 = vector.load %arg5[%c0_8, %c0_9] : memref<32x32xbf16, #tpu.memory_space<vmem>>, vector<32x32xbf16>
    %cst_10 = arith.constant dense<0.000000e+00> : vector<16x32xf32>
    %10 = tpu.matmul %8, %9, %cst_10 {dimension_numbers = #tpu.dot_dimension_numbers<[1], [0], [0], [1], [0, 0, 1, 1], [], []>} : vector<16x32xbf16>, vector<32x32xbf16>, vector<16x32xf32> -> vector<16x32xf32>
    %c0_11 = arith.constant 0 : index
    %c0_12 = arith.constant 0 : index
    %11 = vector.load %arg6[%c0_11, %c0_12] : memref<1x32xf32, #tpu.memory_space<vmem>>, vector<1x32xf32>
    %12 = vector.broadcast %11 : vector<1x32xf32> to vector<16x32xf32>
    %13 = arith.addf %10, %12 : vector<16x32xf32>
    %cst_13 = arith.constant 0.000000e+00 : f32
    %14 = vector.broadcast %cst_13 : f32 to vector<16x32xf32>
    %15 = arith.maximumf %13, %14 : vector<16x32xf32>
    %16 = vector.shape_cast %7 : vector<128x32xf32> to vector<16x8x32xf32>
    %17 = vector.shape_cast %15 : vector<16x32xf32> to vector<16x1x32xf32>
    %18 = vector.broadcast %17 : vector<16x1x32xf32> to vector<16x8x32xf32>
    %19 = arith.mulf %16, %18 : vector<16x8x32xf32>
    %20 = vector.shape_cast %19 : vector<16x8x32xf32> to vector<128x32xf32>
    %21 = arith.truncf %20 : vector<128x32xf32> to vector<128x32xbf16>
    %c0_14 = arith.constant 0 : index
    %c0_15 = arith.constant 0 : index
    %22 = vector.load %arg7[%c0_14, %c0_15] : memref<32x32xbf16, #tpu.memory_space<vmem>>, vector<32x32xbf16>
    %cst_16 = arith.constant dense<0.000000e+00> : vector<128x32xf32>
    %23 = tpu.matmul %21, %22, %cst_16 {dimension_numbers = #tpu.dot_dimension_numbers<[1], [0], [0], [1], [0, 0, 1, 1], [], []>} : vector<128x32xbf16>, vector<32x32xbf16>, vector<128x32xf32> -> vector<128x32xf32>
    %c0_17 = arith.constant 0 : index
    %c0_18 = arith.constant 0 : index
    %24 = vector.load %arg8[%c0_17, %c0_18] : memref<1x32xf32, #tpu.memory_space<vmem>>, vector<1x32xf32>
    %25 = vector.broadcast %24 : vector<1x32xf32> to vector<128x32xf32>
    %26 = arith.addf %23, %25 : vector<128x32xf32>
    %cst_19 = arith.constant 0.000000e+00 : f32
    %27 = vector.broadcast %cst_19 : f32 to vector<128x32xf32>
    %28 = arith.maximumf %26, %27 : vector<128x32xf32>
    %29 = vector.shape_cast %28 : vector<128x32xf32> to vector<16x8x32xf32>
    %c0_20 = arith.constant 0 : index
    %c0_21 = arith.constant 0 : index
    %30 = vector.load %arg9[%c0_20, %c0_21] : memref<1x32xf32, #tpu.memory_space<vmem>>, vector<1x32xf32>
    %31 = vector.shape_cast %30 : vector<1x32xf32> to vector<1x1x32xf32>
    %32 = vector.broadcast %31 : vector<1x1x32xf32> to vector<16x8x32xf32>
    %33 = arith.mulf %29, %32 : vector<16x8x32xf32>
    %cst_22 = arith.constant dense<0.000000e+00> : vector<16x8xf32>
    %34 = vector.multi_reduction <add>, %33, %cst_22 [2] : vector<16x8x32xf32> to vector<16x8xf32>
    %c0_23 = arith.constant 0 : index
    %c0_24 = arith.constant 0 : index
    %35 = vector.load %arg10[%c0_23, %c0_24] : memref<1x1xf32, #tpu.memory_space<vmem>>, vector<1x1xf32>
    %36 = vector.broadcast %35 : vector<1x1xf32> to vector<16x8xf32>
    %37 = arith.addf %34, %36 : vector<16x8xf32>
    %cst_25 = arith.constant dense<0xFF800000> : vector<16xf32>
    %38 = vector.multi_reduction <maximumf>, %37, %cst_25 [1] : vector<16x8xf32> to vector<16xf32>
    %39 = vector.shape_cast %38 : vector<16xf32> to vector<16x1xf32>
    %40 = vector.broadcast %39 : vector<16x1xf32> to vector<16x8xf32>
    %41 = arith.subf %37, %40 : vector<16x8xf32>
    %42 = math.exp %41 : vector<16x8xf32>
    %cst_26 = arith.constant dense<0.000000e+00> : vector<16xf32>
    %43 = vector.multi_reduction <add>, %42, %cst_26 [1] : vector<16x8xf32> to vector<16xf32>
    %44 = vector.shape_cast %43 : vector<16xf32> to vector<16x1xf32>
    %45 = tpu.reciprocal %44 {approx = true} : vector<16x1xf32> -> vector<16x1xf32>
    %46 = vector.broadcast %45 : vector<16x1xf32> to vector<16x8xf32>
    %47 = arith.mulf %42, %46 : vector<16x8xf32>
    %c0_27 = arith.constant 0 : index
    %c0_28 = arith.constant 0 : index
    %48 = vector.load %arg11[%c0_27, %c0_28] : memref<16x8xf32, #tpu.memory_space<vmem>>, vector<16x8xf32>
    tpu.vector_store %arg11[%c0_27, %c0_28], %47 {strides = array<i32>} : memref<16x8xf32, #tpu.memory_space<vmem>>, vector<16x8xf32>,
    return
  }
  func.func @transform_0(%arg0: i32) -> (i32, i32) {
    %c0_i32 = arith.constant 0 : i32
    %c0_i32_0 = arith.constant 0 : i32
    return %arg0, %c0_i32 : i32, i32
  }
  func.func @transform_1(%arg0: i32) -> (i32, i32) {
    %c0_i32 = arith.constant 0 : i32
    %c0_i32_0 = arith.constant 0 : i32
    return %arg0, %c0_i32 : i32, i32
  }
  func.func @transform_2(%arg0: i32) -> (i32, i32) {
    %c0_i32 = arith.constant 0 : i32
    %c0_i32_0 = arith.constant 0 : i32
    %c0_i32_1 = arith.constant 0 : i32
    return %c0_i32, %c0_i32_0 : i32, i32
  }
  func.func @transform_3(%arg0: i32) -> (i32, i32) {
    %c0_i32 = arith.constant 0 : i32
    %c0_i32_0 = arith.constant 0 : i32
    %c0_i32_1 = arith.constant 0 : i32
    return %c0_i32, %c0_i32_0 : i32, i32
  }
  func.func @transform_4(%arg0: i32) -> (i32, i32) {
    %c0_i32 = arith.constant 0 : i32
    %c0_i32_0 = arith.constant 0 : i32
    %c0_i32_1 = arith.constant 0 : i32
    return %c0_i32, %c0_i32_0 : i32, i32
  }
  func.func @transform_5(%arg0: i32) -> (i32, i32) {
    %c0_i32 = arith.constant 0 : i32
    %c0_i32_0 = arith.constant 0 : i32
    %c0_i32_1 = arith.constant 0 : i32
    return %c0_i32, %c0_i32_0 : i32, i32
  }
  func.func @transform_6(%arg0: i32) -> (i32, i32) {
    %c0_i32 = arith.constant 0 : i32
    %c0_i32_0 = arith.constant 0 : i32
    %c0_i32_1 = arith.constant 0 : i32
    return %c0_i32, %c0_i32_0 : i32, i32
  }
  func.func @transform_7(%arg0: i32) -> (i32, i32) {
    %c0_i32 = arith.constant 0 : i32
    %c0_i32_0 = arith.constant 0 : i32
    %c0_i32_1 = arith.constant 0 : i32
    return %c0_i32, %c0_i32_0 : i32, i32
  }
  func.func @transform_8(%arg0: i32) -> (i32, i32) {
    %c0_i32 = arith.constant 0 : i32
    %c0_i32_0 = arith.constant 0 : i32
    %c0_i32_1 = arith.constant 0 : i32
    return %c0_i32, %c0_i32_0 : i32, i32
  }
  func.func @transform_9(%arg0: i32) -> (i32, i32) {
    %c0_i32 = arith.constant 0 : i32
    %c0_i32_0 = arith.constant 0 : i32
    %c0_i32_1 = arith.constant 0 : i32
    return %c0_i32, %c0_i32_0 : i32, i32
  }
  func.func @transform_10(%arg0: i32) -> (i32, i32) {
    %c0_i32 = arith.constant 0 : i32
    %c0_i32_0 = arith.constant 0 : i32
    return %arg0, %c0_i32 : i32, i32
  }
}

</mosaic_0001>

<bundles_post_ra>
// kernel: tpu_custom_call.1
= control target key start
LH: loop header
LB: loop body
LE: loop exit
PB: predicated region body
PF: predicated region fallthrough
CT: control target
= control target key end

     0   :  { %vm109_vm0 = vcmask 130048   ;;  %v1587_v4 = vmov 0.0   ;;  %vm1588_vm1 = vmmov 0   ;;  %vm277_vm2 = vcmask 261120   ;;  %s2154_s2 = inlined_call_operand.vmem [shape: bf16[16,32], index: 2, kind: input, shape index: {}]   ;;  %s2155_s0 = inlined_call_operand.vmem [shape: bf16[128,16], index: 0, kind: input, shape index: {}]   ;;  %s2156_s4 = inlined_call_operand.vmem [shape: bf16[32,32], index: 4, kind: input, shape index: {}]   ;;  %s2157_s1 = inlined_call_operand.vmem [shape: bf16[16,32], index: 1, kind: input, shape index: {}]   ;;  %s2158_s6 = inlined_call_operand.vmem [shape: bf16[32,32], index: 6, kind: input, shape index: {}]   ;;  %s2159_s3 = inlined_call_operand.vmem [shape: f32[1,32], index: 3, kind: input, shape index: {}]   ;;  %s2160_s5 = inlined_call_operand.vmem [shape: f32[1,32], index: 5, kind: input, shape index: {}]   ;;  %s2161_s9 = inlined_call_operand.<no memory space> [shape: f32[1,1], index: 9, kind: input, shape index: {}]   ;;  %s2162_s7 = inlined_call_operand.vmem [shape: f32[1,32], index: 7, kind: input, shape index: {}]   ;;  %s2163_s8 = inlined_call_operand.vmem [shape: f32[1,32], index: 8, kind: input, shape index: {}]   ;;  %s2164_s10 = inlined_call_operand.vmem [shape: f32[16,8], index: 10, kind: output, shape index: {}]  }
   0x1   :  { %v1537_v0 = vld [vmem:[%s2154_s2] sm:$0xff]   ;;  %v1539_v2 = vld [vmem:[%s2155_s0 + $0x8] sm:$0xff]   ;;  %v1541_v5 = vld [vmem:[%s2155_s0 + $0x10] sm:$0xff]   ;;  %v1589_v27 = vmov 1966171168   ;;  %v330_v29 = vlaneseq  ;;  %vm867_vm3 = vcmask 1041409  }
   0x2   :  { %v1538_v1 = vld [vmem:[%s2155_s0] sm:$0xff]   ;;  %1485 = vmatprep.subr.bf16.mxu0 %v1537_v0  ;;  %v1545_v6 = vld [vmem:[%s2156_s4 + $0x8] sm:$0xff]   ;;  %v1542_v7 = vld [vmem:[%s2155_s0 + $0x18] sm:$0xff]   ;;  %v328_v28 = vunpack.c.l.s4 %v1589_v27  ;;  %vm869_vm4 = vcmask 1042434   ;;  %vm871_vm5 = vcmask 1043459   ;;  %vm873_vm6 = vcmask 1044484  }
   0x3   :  { %1486 = vmatpush3.bf16.msra.mxu0 %v1537_v0  ;;  %1487 = vmatprep.mubr.msk.bf16.mxu0 %vm109_vm0, %v1538_v1  ;;  %v1540_v3 = vld [vmem:[%s2156_s4] sm:$0xff]   ;;  %v1544_v9 = vld [vmem:[%s2155_s0 + $0x28] sm:$0xff]   ;;  %v1546_v10 = vld [vmem:[%s2155_s0 + $0x30] sm:$0xff]   ;;  %v1701_v36 = vshrl.u32 %v330_v29, 7  ;;  %vm875_vm7 = vcmask 1045509   ;;  %vm877_vm8 = vcmask 1046534  }
   0x4   :  { %1503 = vmatprep.subr.bf16.mxu0 %v1587_v4  ;;  %v1543_v8 = vld [vmem:[%s2155_s0 + $0x20] sm:$0xff]   ;;  %v1547_v11 = vld [vmem:[%s2155_s0 + $0x38] sm:$0xff]   ;;  %v1550_v14 = vld [vmem:[%s2158_s6 + $0x8] sm:$0xff]   ;;  %v329_v35 = vunpack.c.0.s8 %v328_v28  ;;  %vm879_vm9 = vcmask 1047559   ;;  %vm890_vm10 = vcmask 64512  }
   0x5   :  { %v1548_v12 = vld [vmem:[%s2157_s1] sm:$0xff]   ;;  %v1720_v45 = vsub.s32 0, %v1701_v36 }
   0x6   :  { %1488 = vmatmul.mubr.msk.bf16.vlgmr.msra.gmra.mrb[0].mxu0 %vm109_vm0, %v1539_v2  ;;  %v1549_v13 = vld [vmem:[%s2158_s6] sm:$0xff]   ;;  %v332_v44 = vsub.s32 %v329_v35, %v1701_v36 }
   0x7   :  { %1504 = vmatpush3.bf16.msra.mxu0 %v1540_v3  ;;  %1491 = vmatprep.mubr.msk.bf16.mxu0 %vm109_vm0, %v1541_v5  ;;  %v1427_v31 = vld [vmem:[%s2159_s3] ss:$0 sm:$0xff] }
   0x8   :  { %1505 = vmatprep.subr.bf16.mxu0 %v1587_v4  ;;  %1511 = vmatprep.subr.bf16.mxu1 %v1549_v13  ;;  %v1445_v41 = vld [vmem:[%s2160_s5] ss:$0 sm:$0xff] }
   0x9   :  { %1512 = vmatpush3.bf16.msra.mxu1 %v1549_v13 }
   0xa   :  { %1513 = vmatprep.subr.bf16.mxu1 %v1550_v14 }
   0xb   :  { %1506 = vmatpush3.bf16.msra.mxu0 %v1545_v6 }
   0xd   :  { %1514 = vmatpush3.bf16.msra.mxu1 %v1550_v14 }
   0xe   :  { %1492 = vmatmul.mubr.msk.bf16.gmra.mrb[4].mxu0 %vm109_vm0, %v1542_v7 }
   0xf   :  { %1495 = vmatprep.mubr.msk.bf16.mxu0 %vm109_vm0, %v1543_v8 }
  0x16   :  { %1496 = vmatmul.mubr.msk.bf16.gmra.mrb[8].mxu0 %vm109_vm0, %v1544_v9 }
  0x17   :  { %1499 = vmatprep.mubr.msk.bf16.mxu0 %vm109_vm0, %v1546_v10 }
  0x1e   :  { %1500 = vmatmul.mubr.msk.bf16.gmra.mrb[12].mxu0 %vm109_vm0, %v1547_v11 }
  0x1f   :  { %1507 = vmatprep.mubr.msk.bf16.mxu0 %vm1588_vm1, %v1587_v4 }
  0x26   :  { %1508 = vmatmul.mubr.msk.bf16.vlgmr.msra.gmra.mrb[16].mxu0 %vm277_vm2, %v1548_v12 }
  0xd9   :  { %v1489_v15 = vpop.f32.mrb[0].mxu0 }
  0xda   :  { %v168_v16 = vpop.f32.mrb[1].mxu0  ;;  %v1703_v37 = vadd.f32 %v1489_v15, %v1427_v31 }
  0xdb   :  { %v1490_v17 = vpop.f32.mrb[2].mxu0  ;;  %v1705_v38 = vadd.f32 %v1427_v31, %v168_v16 }
  0xdc   :  { %v171_v18 = vpop.f32.mrb[3].mxu0  ;;  %v1707_v39 = vadd.f32 %v1490_v17, %v1427_v31  ;;  %v233_v46 = vmax.f32 %v1703_v37, 0.0 }
  0xdd   :  { %v1709_v40 = vadd.f32 %v1427_v31, %v171_v18  ;;  %v231_v47 = vmax.f32 %v1705_v38, 0.0 }
  0xde   :  { %v234_v51 = vmax.f32 %v1707_v39, 0.0 }
  0xdf   :  { %v232_v52 = vmax.f32 %v1709_v40, 0.0 }
  0xe1   :  { %v1493_v19 = vpop.f32.mrb[4].mxu0 }
  0xe2   :  { %v184_v20 = vpop.f32.mrb[5].mxu0  ;;  %v1714_v42 = vadd.f32 %v1493_v19, %v1427_v31 }
  0xe3   :  { %v1494_v21 = vpop.f32.mrb[6].mxu0  ;;  %v1716_v43 = vadd.f32 %v1427_v31, %v184_v20 }
  0xe4   :  { %v187_v22 = vpop.f32.mrb[7].mxu0  ;;  %v1724_v48 = vadd.f32 %v1494_v21, %v1427_v31  ;;  %v237_v61 = vmax.f32 %v1714_v42, 0.0 }
  0xe5   :  { %v1726_v49 = vadd.f32 %v1427_v31, %v187_v22  ;;  %v235_v62 = vmax.f32 %v1716_v43, 0.0 }
  0xe6   :  { %v238_v2 = vmax.f32 %v1724_v48, 0.0 }
  0xe7   :  { %v236_v3 = vmax.f32 %v1726_v49, 0.0 }
  0xe9   :  { %v1497_v23 = vpop.f32.mrb[8].mxu0 }
  0xea   :  { %v200_v24 = vpop.f32.mrb[9].mxu0  ;;  %v1730_v53 = vadd.f32 %v1497_v23, %v1427_v31 }
  0xeb   :  { %v1498_v25 = vpop.f32.mrb[10].mxu0  ;;  %v1732_v56 = vadd.f32 %v1427_v31, %v200_v24 }
  0xec   :  { %v203_v26 = vpop.f32.mrb[11].mxu0  ;;  %v1734_v57 = vadd.f32 %v1498_v25, %v1427_v31  ;;  %v241_v6 = vmax.f32 %v1730_v53, 0.0 }
  0xed   :  { %v1736_v58 = vadd.f32 %v1427_v31, %v203_v26  ;;  %v239_v10 = vmax.f32 %v1732_v56, 0.0 }
  0xee   :  { %v242_v11 = vmax.f32 %v1734_v57, 0.0 }
  0xef   :  { %v240_v12 = vmax.f32 %v1736_v58, 0.0 }
  0xf1   :  { %v1501_v30 = vpop.f32.mrb[12].mxu0 }
  0xf2   :  { %v216_v32 = vpop.f32.mrb[13].mxu0  ;;  %v1738_v59 = vadd.f32 %v1501_v30, %v1427_v31 }
  0xf3   :  { %v1502_v33 = vpop.f32.mrb[14].mxu0  ;;  %v1744_v4 = vadd.f32 %v1427_v31, %v216_v32 }
  0xf4   :  { %v219_v34 = vpop.f32.mrb[15].mxu0  ;;  %v245_v13 = vmax.f32 %v1738_v59, 0.0  ;;  %v1754_v19 = vadd.f32 %v1502_v33, %v1427_v31  ;;  %v15_v59 = vstv %s2161_s9 }
  0xf5   :  { %v1746_v5 = vadd.f32 %v1427_v31, %v219_v34  ;;  %v243_v18 = vmax.f32 %v1744_v4, 0.0  ;;  %16 = vst [vmem:[#allocation2] sm:$0x1] %v15_v59 }
  0xf7   :  { %v244_v20 = vmax.f32 %v1746_v5, 0.0 }
  0xf9   :  { %v315_v50 = vpop.f32.mrb[16].mxu0 }
  0xfa   :  { %v316_v54 = vadd.f32 %v1445_v41, %v315_v50  ;;  %v1509_v55 = vpop.f32.mrb[17].mxu0 }
  0xfb   :  { %v318_v60 = vpop.f32.mrb[18].mxu0 }
  0xfc   :  { %v322_v63 = vmax.f32 %v316_v54, 0.0  ;;  %v319_v0 = vadd.f32 %v1445_v41, %v318_v60  ;;  %v1510_v1 = vpop.f32.mrb[19].mxu0 }
  0xfe   :  { %v326_v7 = vcombine.high %v322_v63, %v322_v63  ;;  %v333_v8 = vrot.slane %v322_v63, %v332_v44  ;;  %v323_v9 = vmax.f32 %v319_v0, 0.0 }
 0x100   :  { %v340_v14 = vrot.slane %v326_v7, %v332_v44  ;;  %v341_v15 = vcombine.high %v333_v8, %v333_v8  ;;  %v349_v16 = vrot.slane %v333_v8, %v332_v44  ;;  %v375_v17 = vcombine.high %v323_v9, %v323_v9 }
 0x101   :  { %v382_v21 = vrot.slane %v323_v9, %v332_v44 }
 0x102   :  { %v342_v22 = vcombine.high %v340_v14, %v340_v14  ;;  %v356_v23 = vrot.slane %v340_v14, %v332_v44  ;;  %v363_v24 = vrot.slane %v341_v15, %v332_v44  ;;  %v371_v25 = vcombine.high %v349_v16, %v349_v16 }
 0x103   :  { %v389_v26 = vrot.slane %v375_v17, %v332_v44  ;;  %v390_v27 = vcombine.high %v382_v21, %v382_v21  ;;  %v398_v28 = vrot.slane %v382_v21, %v332_v44  ;;  %v427_v30 = vrot.slane %v349_v16, %v1720_v45 }
 0x104   :  { %v370_v32 = vrot.slane %v342_v22, %v332_v44  ;;  %v372_v34 = vcombine.high %v356_v23, %v356_v23  ;;  %v373_v35 = vcombine.high %v363_v24, %v363_v24  ;;  %v435_v41 = vrot.slane %v371_v25, %v1720_v45 }
 0x105   :  { %v443_v31 = vrot.slane %v356_v23, %v1720_v45  ;;  %v391_v33 = vcombine.high %v389_v26, %v389_v26  ;;  %v405_v43 = vrot.slane %v389_v26, %v332_v44  ;;  %v412_v49 = vrot.slane %v390_v27, %v332_v44 }
 0x106   :  { %v374_v50 = vcombine.high %v370_v32, %v370_v32  ;;  %v439_v53 = vrot.slane %v373_v35, %v1720_v45  ;;  %v447_v54 = vrot.slane %v370_v32, %v1720_v45  ;;  %v451_v55 = vrot.slane %v372_v34, %v1720_v45 }
 0x107   :  { %v419_v56 = vrot.slane %v391_v33, %v332_v44  ;;  %v420_v57 = vcombine.high %v398_v28, %v398_v28  ;;  %v421_v58 = vcombine.high %v405_v43, %v405_v43  ;;  %v422_v60 = vcombine.high %v412_v49, %v412_v49 }
 0x108   :  { %v459_v63 = vrot.slane %v398_v28, %v1720_v45  ;;  %v463_v0 = vrot.slane %v412_v49, %v1720_v45  ;;  %v475_v1 = vrot.slane %v405_v43, %v1720_v45  ;;  %v431_v4 = vrot.slane %v363_v24, %v1720_v45 }
 0x109   :  { %v423_v5 = vcombine.high %v419_v56, %v419_v56  ;;  %v467_v7 = vrot.slane %v420_v57, %v1720_v45  ;;  %v471_v8 = vrot.slane %v422_v60, %v1720_v45  ;;  %v479_v9 = vrot.slane %v419_v56, %v1720_v45 }
 0x10a   :  { %v483_v44 = vrot.slane %v421_v58, %v1720_v45  ;;  %v512_v14 = vmul.f32 %v459_v63, %v239_v10  ;;  %v504_v15 = vmul.f32 %v427_v30, %v231_v47  ;;  %v505_v16 = vmul.f32 %v431_v4, %v232_v52  ;;  %v1809_v30 = vld [vmem:[%s2163_s8] ss:$0 sm:$0xff] }
 0x10b   :  { %v506_v17 = vmul.f32 %v435_v41, %v233_v46  ;;  %v507_v21 = vmul.f32 %v439_v53, %v234_v51  ;;  %v508_v22 = vmul.f32 %v443_v31, %v235_v62  ;;  %v509_v23 = vmul.f32 %v447_v54, %v236_v3 }
 0x10c   :  { %v520_v24 = vpack.c.bf16 %v505_v16, %v504_v15  ;;  %v455_v25 = vrot.slane %v374_v50, %v1720_v45  ;;  %v510_v10 = vmul.f32 %v451_v55, %v237_v61  ;;  %v513_v26 = vmul.f32 %v463_v0, %v240_v12  ;;  %v1802_v12 = vld [vmem:[%s2162_s7] ss:$0 sm:$0xff] }
 0x10d   :  { %v521_v38 = vpack.c.bf16 %v507_v21, %v506_v17  ;;  %v522_v47 = vpack.c.bf16 %v509_v23, %v508_v22  ;;  %v514_v27 = vmul.f32 %v467_v7, %v241_v6  ;;  %v515_v40 = vmul.f32 %v471_v8, %v242_v11 }
 0x10e   :  { %1515 = vmatprep.mubr.msk.bf16.mxu1 %vm277_vm2, %v520_v24  ;;  %v511_v37 = vmul.f32 %v455_v25, %v238_v2  ;;  %v524_v39 = vpack.c.bf16 %v513_v26, %v512_v14  ;;  %v516_v46 = vmul.f32 %v475_v1, %v243_v18  ;;  %v517_v51 = vmul.f32 %v479_v9, %v244_v20 }
 0x10f   :  { %v246_v52 = vmax.f32 %v1754_v19, 0.0  ;;  %1516 = vmatmul.mubr.msk.bf16.vlgmr.msra.gmra.mrb[0].mxu1 %vm277_vm2, %v521_v38  ;;  %v525_v62 = vpack.c.bf16 %v515_v40, %v514_v27  ;;  %v487_v42 = vrot.slane %v423_v5, %v1720_v45  ;;  %v518_v61 = vmul.f32 %v483_v44, %v245_v13 }
 0x110   :  { %1519 = vmatprep.mubr.msk.bf16.mxu1 %vm277_vm2, %v522_v47  ;;  %v523_v3 = vpack.c.bf16 %v511_v37, %v510_v10  ;;  %v526_v6 = vpack.c.bf16 %v517_v51, %v516_v46  ;;  %v1590_v2 = vmov 0  }
 0x111   :  { %v519_v11 = vmul.f32 %v487_v42, %v246_v52  ;;  %1535 = vset.pattern.permute.xlu0 %v1590_v2  ;;  %1536 = vset.pattern.permute.xlu1 %v1590_v2 }
 0x113   :  { %v527_v48 = vpack.c.bf16 %v519_v11, %v518_v61 }
 0x117   :  { %1520 = vmatmul.mubr.msk.bf16.gmra.mrb[4].mxu1 %vm277_vm2, %v523_v3 }
 0x118   :  { %1523 = vmatprep.mubr.msk.bf16.mxu1 %vm277_vm2, %v524_v39 }
 0x11f   :  { %1524 = vmatmul.mubr.msk.bf16.gmra.mrb[8].mxu1 %vm277_vm2, %v525_v62 }
 0x120   :  { %1527 = vmatprep.mubr.msk.bf16.mxu1 %vm277_vm2, %v526_v6 }
 0x127   :  { %1528 = vmatmul.mubr.msk.bf16.gmra.mrb[12].mxu1 %vm277_vm2, %v527_v48 }
 0x1e2   :  { %v1517_v13 = vpop.f32.mrb[0].mxu1 }
 0x1e3   :  { %v618_v18 = vadd.f32 %v1517_v13, %v1802_v12  ;;  %v609_v19 = vpop.f32.mrb[1].mxu1 }
 0x1e4   :  { %v610_v20 = vadd.f32 %v1802_v12, %v609_v19  ;;  %v1518_v28 = vpop.f32.mrb[2].mxu1 }
 0x1e5   :  { %v674_v32 = vmax.f32 %v618_v18, 0.0  ;;  %v621_v34 = vadd.f32 %v1518_v28, %v1802_v12  ;;  %v612_v35 = vpop.f32.mrb[3].mxu1 }
 0x1e6   :  { %v672_v41 = vmax.f32 %v610_v20, 0.0  ;;  %v613_v43 = vadd.f32 %v1802_v12, %v612_v35 }
 0x1e7   :  { %v697_v31 = vmul.f32 %v1809_v30, %v674_v32  ;;  %v675_v33 = vmax.f32 %v621_v34, 0.0 }
 0x1e8   :  { %v695_v50 = vmul.f32 %v1809_v30, %v672_v41  ;;  %v673_v57 = vmax.f32 %v613_v43, 0.0 }
 0x1e9   :  { %v717_v49 = vsel %vm277_vm2, %v697_v31, 0.0  ;;  %v698_v63 = vmul.f32 %v1809_v30, %v675_v33 }
 0x1ea   :  { %718 = vadd.xlane.f32.xlu0 %v717_v49  ;;  %v1521_v53 = vpop.f32.mrb[4].mxu1  ;;  %v711_v60 = vsel %vm277_vm2, %v695_v50, 0.0  ;;  %v696_v5 = vmul.f32 %v1809_v30, %v673_v57 }
 0x1eb   :  { %v625_v54 = vpop.f32.mrb[5].mxu1  ;;  %v634_v55 = vadd.f32 %v1521_v53, %v1802_v12  ;;  %v720_v4 = vsel %vm277_vm2, %v698_v63, 0.0 }
 0x1ec   :  { %v1522_v56 = vpop.f32.mrb[6].mxu1  ;;  %v626_v1 = vadd.f32 %v1802_v12, %v625_v54  ;;  %v714_v24 = vsel %vm277_vm2, %v696_v5, 0.0 }
 0x1ed   :  { %v628_v58 = vpop.f32.mrb[7].mxu1  ;;  %v678_v0 = vmax.f32 %v634_v55, 0.0  ;;  %v637_v14 = vadd.f32 %v1522_v56, %v1802_v12 }
 0x1ee   :  { %712 = vadd.xlane.f32.xlu0 %v711_v60  ;;  %v676_v44 = vmax.f32 %v626_v1, 0.0  ;;  %v629_v38 = vadd.f32 %v1802_v12, %v628_v58 }
 0x1ef   :  { %v701_v17 = vmul.f32 %v1809_v30, %v678_v0  ;;  %v679_v26 = vmax.f32 %v637_v14, 0.0 }
 0x1f0   :  { %v699_v27 = vmul.f32 %v1809_v30, %v676_v44  ;;  %v677_v62 = vmax.f32 %v629_v38, 0.0 }
 0x1f1   :  { %v729_v47 = vsel %vm277_vm2, %v701_v17, 0.0  ;;  %v702_v3 = vmul.f32 %v1809_v30, %v679_v26 }
 0x1f2   :  { %v1525_v7 = vpop.f32.mrb[8].mxu1  ;;  %721 = vadd.xlane.f32.xlu0 %v720_v4  ;;  %v723_v61 = vsel %vm277_vm2, %v699_v27, 0.0  ;;  %v700_v18 = vmul.f32 %v1809_v30, %v677_v62 }
 0x1f3   :  { %v650_v8 = vadd.f32 %v1525_v7, %v1802_v12  ;;  %v641_v9 = vpop.f32.mrb[9].mxu1  ;;  %v732_v13 = vsel %vm277_vm2, %v702_v3, 0.0 }
 0x1f4   :  { %v642_v15 = vadd.f32 %v1802_v12, %v641_v9  ;;  %v1526_v16 = vpop.f32.mrb[10].mxu1  ;;  %v726_v34 = vsel %vm277_vm2, %v700_v18, 0.0 }
 0x1f5   :  { %v682_v21 = vmax.f32 %v650_v8, 0.0  ;;  %v653_v22 = vadd.f32 %v1526_v16, %v1802_v12  ;;  %v644_v23 = vpop.f32.mrb[11].mxu1  ;;  %v802_v16 = vand.u32 127, %v330_v29 }
 0x1f6   :  { %v680_v25 = vmax.f32 %v642_v15, 0.0  ;;  %715 = vadd.xlane.f32.xlu0 %v714_v24  ;;  %v645_v37 = vadd.f32 %v1802_v12, %v644_v23 }
 0x1f7   :  { %v705_v10 = vmul.f32 %v1809_v30, %v682_v21  ;;  %v683_v40 = vmax.f32 %v653_v22, 0.0  ;;  %v1859_v21 = vsub.s32 %v802_v16, %v1701_v36 }
 0x1f8   :  { %v703_v46 = vmul.f32 %v1809_v30, %v680_v25  ;;  %v681_v6 = vmax.f32 %v645_v37, 0.0 }
 0x1f9   :  { %v741_v39 = vsel %vm277_vm2, %v705_v10, 0.0  ;;  %v706_v2 = vmul.f32 %v1809_v30, %v683_v40 }
 0x1fa   :  { %742 = vadd.xlane.f32.xlu1 %v741_v39  ;;  %v1529_v51 = vpop.f32.mrb[12].mxu1  ;;  %730 = vadd.xlane.f32.xlu0 %v729_v47  ;;  %v735_v59 = vsel %vm277_vm2, %v703_v46, 0.0  ;;  %v704_v32 = vmul.f32 %v1809_v30, %v681_v6 }
 0x1fb   :  { %v657_v52 = vpop.f32.mrb[13].mxu1  ;;  %v666_v11 = vadd.f32 %v1529_v51, %v1802_v12  ;;  %v744_v28 = vsel %vm277_vm2, %v706_v2, 0.0 }
 0x1fc   :  { %v1530_v42 = vpop.f32.mrb[14].mxu1  ;;  %v658_v20 = vadd.f32 %v1802_v12, %v657_v52  ;;  %v738_v31 = vsel %vm277_vm2, %v704_v32, 0.0 }
 0x1fd   :  { %v660_v48 = vpop.f32.mrb[15].mxu1  ;;  %v686_v19 = vmax.f32 %v666_v11, 0.0  ;;  %v669_v43 = vadd.f32 %v1530_v42, %v1802_v12 }
 0x1fe   :  { %736 = vadd.xlane.f32.xlu1 %v735_v59  ;;  %724 = vadd.xlane.f32.xlu0 %v723_v61  ;;  %v684_v35 = vmax.f32 %v658_v20, 0.0  ;;  %v661_v41 = vadd.f32 %v1802_v12, %v660_v48  ;;  %v1462_v12 = vld [vmem:[#allocation2] ss:$0 sm:$0xff] }
 0x1ff   :  { %v709_v33 = vmul.f32 %v1809_v30, %v686_v19  ;;  %v687_v54 = vmax.f32 %v669_v43, 0.0 }
 0x200   :  { %v685_v49 = vmax.f32 %v661_v41, 0.0  ;;  %v707_v53 = vmul.f32 %v1809_v30, %v684_v35 }
 0x201   :  { %v753_v50 = vsel %vm277_vm2, %v709_v33, 0.0  ;;  %v710_v58 = vmul.f32 %v1809_v30, %v687_v54 }
 0x202   :  { %745 = vadd.xlane.f32.xlu1 %v744_v28  ;;  %733 = vadd.xlane.f32.xlu0 %v732_v13  ;;  %v747_v55 = vsel %vm277_vm2, %v707_v53, 0.0  ;;  %v708_v56 = vmul.f32 %v1809_v30, %v685_v49 }
 0x203   :  { %v756_v60 = vsel %vm277_vm2, %v710_v58, 0.0 }
 0x204   :  { %v750_v57 = vsel %vm277_vm2, %v708_v56, 0.0 }
 0x206   :  { %739 = vadd.xlane.f32.xlu1 %v738_v31  ;;  %727 = vadd.xlane.f32.xlu0 %v726_v34 }
 0x20a   :  { %754 = vadd.xlane.f32.xlu1 %v753_v50 }
 0x20e   :  { %748 = vadd.xlane.f32.xlu1 %v747_v55 }
 0x212   :  { %751 = vadd.xlane.f32.xlu1 %v750_v57 }
 0x216   :  { %757 = vadd.xlane.f32.xlu1 %v756_v60 }
 0x21c   :  { %766 = vperm.xlu0 %1535, %v1462_v12  }
 0x277   :  { %v719_v63 = vpop.xlane.xlu0 %718 }
 0x27b   :  { %v713_v0 = vpop.xlane.xlu0 %712 }
 0x27f   :  { %v722_v1 = vpop.xlane.xlu0 %721 }
 0x283   :  { %v716_v4 = vpop.xlane.xlu0 %715 }
 0x287   :  { %v743_v5 = vpop.xlane.xlu1 %742  ;;  %v731_v7 = vpop.xlane.xlu0 %730 }
 0x28b   :  { %v737_v8 = vpop.xlane.xlu1 %736  ;;  %v725_v9 = vpop.xlane.xlu0 %724 }
 0x28f   :  { %v746_v44 = vpop.xlane.xlu1 %745  ;;  %v734_v14 = vpop.xlane.xlu0 %733 }
 0x293   :  { %v740_v15 = vpop.xlane.xlu1 %739  ;;  %v728_v30 = vpop.xlane.xlu0 %727 }
 0x297   :  { %v755_v17 = vpop.xlane.xlu1 %754 }
 0x29b   :  { %v749_v22 = vpop.xlane.xlu1 %748  ;;  %v767_v23 = vpop.permute.xlu0 %766 }
 0x29c   :  { %v1861_v24 = vadd.f32 %v767_v23, %v713_v0  ;;  %v1863_v25 = vadd.f32 %v767_v23, %v716_v4  ;;  %v1865_v10 = vadd.f32 %v767_v23, %v719_v63  ;;  %v1867_v26 = vadd.f32 %v767_v23, %v722_v1 }
 0x29d   :  { %v1869_v29 = vadd.f32 %v767_v23, %v725_v9  ;;  %v1871_v38 = vadd.f32 %v767_v23, %v728_v30  ;;  %v1879_v39 = vadd.f32 %v767_v23, %v731_v7  ;;  %v1881_v46 = vadd.f32 %v767_v23, %v734_v14 }
 0x29e   :  { %v806_v47 = vrot.slane %v1861_v24, %v1859_v21  ;;  %v810_v27 = vrot.slane %v1863_v25, %v1859_v21  ;;  %v814_v40 = vrot.slane %v1865_v10, %v1859_v21  ;;  %v818_v51 = vrot.slane %v1867_v26, %v1859_v21 }
 0x29f   :  { %v752_v37 = vpop.xlane.xlu1 %751  ;;  %v822_v52 = vrot.slane %v1869_v29, %v1859_v21  ;;  %v1888_v42 = vadd.f32 %v767_v23, %v737_v8  ;;  %v1890_v61 = vadd.f32 %v767_v23, %v740_v15  ;;  %v1895_v11 = vadd.f32 %v767_v23, %v743_v5 }
 0x2a0   :  { %v868_v62 = vsel %vm867_vm3, %v810_v27, %v806_v47  ;;  %v1892_v3 = vadd.f32 %v767_v23, %v752_v37  ;;  %v1897_v48 = vadd.f32 %v767_v23, %v746_v44  ;;  %v826_v59 = vrot.slane %v1871_v38, %v1859_v21 }
 0x2a1   :  { %v870_v6 = vsel %vm869_vm4, %v814_v40, %v868_v62  ;;  %v1902_v13 = vadd.f32 %v767_v23, %v749_v22  ;;  %v838_v18 = vrot.slane %v1888_v42, %v1859_v21  ;;  %v830_v20 = vrot.slane %v1879_v39, %v1859_v21 }
 0x2a2   :  { %v872_v2 = vsel %vm871_vm5, %v818_v51, %v870_v6  ;;  %v842_v32 = vrot.slane %v1890_v61, %v1859_v21  ;;  %v846_v34 = vrot.slane %v1895_v11, %v1859_v21  ;;  %v834_v41 = vrot.slane %v1881_v46, %v1859_v21 }
 0x2a3   :  { %v758_v19 = vpop.xlane.xlu1 %757  ;;  %v874_v28 = vsel %vm873_vm6, %v822_v52, %v872_v2  ;;  %v1918_v33 = vadd.f32 %v767_v23, %v755_v17  ;;  %v858_v43 = vrot.slane %v1892_v3, %v1859_v21  ;;  %v850_v50 = vrot.slane %v1897_v48, %v1859_v21 }
 0x2a4   :  { %v1913_v35 = vadd.f32 %v767_v23, %v758_v19  ;;  %v876_v31 = vsel %vm875_vm7, %v826_v59, %v874_v28  ;;  %v881_v53 = vsel %vm867_vm3, %v842_v32, %v838_v18  ;;  %v854_v55 = vrot.slane %v1902_v13, %v1859_v21 }
 0x2a5   :  { %v878_v49 = vsel %vm877_vm8, %v830_v20, %v876_v31  ;;  %v882_v56 = vsel %vm869_vm4, %v846_v34, %v881_v53  ;;  %v862_v12 = vrot.slane %v1918_v33, %v1859_v21  ;;  %v1942_v7 = vsub.s32 1, %v1701_v36 }
 0x2a6   :  { %v880_v54 = vsel %vm879_vm9, %v834_v41, %v878_v49  ;;  %v866_v57 = vrot.slane %v1913_v35, %v1859_v21  ;;  %v883_v60 = vsel %vm871_vm5, %v850_v50, %v882_v56  ;;  %v1945_v8 = vsub.s32 3, %v1701_v36 }
 0x2a7   :  { %v891_v58 = vsel %vm890_vm10, %v880_v54, -inf  ;;  %v884_v63 = vsel %vm873_vm6, %v854_v55, %v883_v60  ;;  %v1948_v9 = vsub.s32 4, %v1701_v36  ;;  %v1951_v44 = vsub.s32 2, %v1701_v36 }
 0x2a8   :  { %892 = vmax.xlane.f32.xlu1 %v891_v58  ;;  %v885_v0 = vsel %vm875_vm7, %v858_v43, %v884_v63  ;;  %v1957_v17 = vsub.s32 5, %v1701_v36  ;;  %v1967_v52 = vsub.s32 6, %v1701_v36 }
 0x2a9   :  { %v886_v1 = vsel %vm877_vm8, %v862_v12, %v885_v0 }
 0x2aa   :  { %v887_v4 = vsel %vm879_vm9, %v866_v57, %v886_v1 }
 0x2ab   :  { %v894_v5 = vsel %vm890_vm10, %v887_v4, -inf }
 0x2ac   :  { %895 = vmax.xlane.f32.xlu1 %v894_v5 }
 0x335   :  { %v893_v14 = vpop.xlane.xlu1 %892 }
 0x336   :  { %v902_v15 = vrot.slane %v893_v14, %v1720_v45  ;;  %v906_v16 = vrot.slane %v893_v14, %v1942_v7  ;;  %v914_v30 = vrot.slane %v893_v14, %v1945_v8  ;;  %v918_v22 = vrot.slane %v893_v14, %v1948_v9 }
 0x337   :  { %v910_v23 = vrot.slane %v893_v14, %v1951_v44  ;;  %v922_v62 = vrot.slane %v893_v14, %v1957_v17 }
 0x338   :  { %v979_v47 = vsub.f32 %v1861_v24, %v902_v15  ;;  %v980_v27 = vsub.f32 %v1863_v25, %v906_v16  ;;  %v982_v40 = vsub.f32 %v1867_v26, %v914_v30  ;;  %v983_v6 = vsub.f32 %v1869_v29, %v918_v22 }
 0x339   :  { %v1964_v51 = vpop.xlane.xlu1 %895  ;;  %v981_v2 = vsub.f32 %v1865_v10, %v910_v23  ;;  %v1975_v25 = vsub.s32 7, %v1701_v36  ;;  %v926_v26 = vrot.slane %v893_v14, %v1967_v52  ;;  %v984_v19 = vsub.f32 %v1871_v38, %v922_v62 }
 0x33a   :  { %v995_v37 = vmul.f32 1.442695, %v979_v47  ;;  %v1001_v59 = vmul.f32 1.442695, %v982_v40  ;;  %v997_v18 = vmul.f32 1.442695, %v980_v27  ;;  %v934_v24 = vrot.slane %v1964_v51, %v1720_v45 }
 0x33b   :  { %v1003_v20 = vmul.f32 1.442695, %v983_v6  ;;  %v999_v28 = vmul.f32 1.442695, %v981_v2  ;;  %v938_v29 = vrot.slane %v1964_v51, %v1942_v7  ;;  %v930_v32 = vrot.slane %v893_v14, %v1975_v25 }
 0x33c   :  { %1551 = vpow2.f32 %v995_v37  ;;  %v987_v10 = vsub.f32 %v1888_v42, %v934_v24  ;;  %v985_v34 = vsub.f32 %v1879_v39, %v926_v26  ;;  %v1005_v36 = vmul.f32 1.442695, %v984_v19 }
 0x33d   :  { %1553 = vpow2.f32 %v1001_v59  ;;  %v942_v41 = vrot.slane %v1964_v51, %v1951_v44  ;;  %v988_v38 = vsub.f32 %v1890_v61, %v938_v29  ;;  %v986_v49 = vsub.f32 %v1881_v46, %v930_v32 }
 0x33e   :  { %1555 = vpow2.f32 %v997_v18  ;;  %v1011_v31 = vmul.f32 1.442695, %v987_v10  ;;  %v1007_v50 = vmul.f32 1.442695, %v985_v34  ;;  %v946_v39 = vrot.slane %v1964_v51, %v1945_v8 }
 0x33f   :  { %1557 = vpow2.f32 %v1003_v20  ;;  %v989_v42 = vsub.f32 %v1895_v11, %v942_v41  ;;  %v1013_v53 = vmul.f32 1.442695, %v988_v38  ;;  %v1009_v61 = vmul.f32 1.442695, %v986_v49 }
 0x340   :  { %1559 = vpow2.f32 %v999_v28  ;;  %v950_v46 = vrot.slane %v1964_v51, %v1948_v9  ;;  %v990_v56 = vsub.f32 %v1897_v48, %v946_v39  ;;  %v954_v60 = vrot.slane %v1964_v51, %v1957_v17 }
 0x341   :  { %1561 = vpow2.f32 %v1005_v36  ;;  %v1015_v57 = vmul.f32 1.442695, %v989_v42  ;;  %v958_v1 = vrot.slane %v1964_v51, %v1967_v52  ;;  %v962_v15 = vrot.slane %v1964_v51, %v1975_v25 }
 0x342   :  { %1563 = vpow2.f32 %v1011_v31  ;;  %v991_v12 = vsub.f32 %v1902_v13, %v950_v46  ;;  %v1017_v63 = vmul.f32 1.442695, %v990_v56  ;;  %v992_v4 = vsub.f32 %v1892_v3, %v954_v60 }
 0x343   :  { %1565 = vpow2.f32 %v1007_v50  ;;  %v993_v16 = vsub.f32 %v1918_v33, %v958_v1  ;;  %v994_v23 = vsub.f32 %v1913_v35, %v962_v15 }
 0x344   :  { %1567 = vpow2.f32 %v1013_v53  ;;  %v1019_v5 = vmul.f32 1.442695, %v991_v12  ;;  %v1021_v30 = vmul.f32 1.442695, %v992_v4 }
 0x345   :  { %1569 = vpow2.f32 %v1009_v61  ;;  %v1023_v47 = vmul.f32 1.442695, %v993_v16  ;;  %v1025_v33 = vmul.f32 1.442695, %v994_v23 }
 0x346   :  { %v1987_v43 = vpop.eup %1551  ;;  %1571 = vpow2.f32 %v1015_v57 }
 0x347   :  { %1044 = vperm.xlu1 %1536, %v1987_v43   ;;  %v1994_v54 = vpop.eup %1553  ;;  %1573 = vpow2.f32 %v1017_v63 }
 0x348   :  { %v1996_v55 = vpop.eup %1555  ;;  %1053 = vperm.xlu0 %1535, %v1994_v54   ;;  %1575 = vpow2.f32 %v1019_v5 }
 0x349   :  { %v2003_v11 = vpop.eup %1557  ;;  %1577 = vpow2.f32 %v1021_v30 }
 0x34a   :  { %v2005_v58 = vpop.eup %1559  ;;  %1579 = vpow2.f32 %v1023_v47 }
 0x34b   :  { %1047 = vperm.xlu1 %1536, %v1996_v55   ;;  %v2012_v0 = vpop.eup %1561  ;;  %1581 = vpow2.f32 %v1025_v33 }
 0x34c   :  { %1056 = vperm.xlu0 %1535, %v2003_v11   ;;  %v2014_v48 = vpop.eup %1563 }
 0x34d   :  { %v2021_v14 = vpop.eup %1565 }
 0x34e   :  { %v2023_v13 = vpop.eup %1567 }
 0x34f   :  { %1050 = vperm.xlu1 %1536, %v2005_v58   ;;  %v2030_v22 = vpop.eup %1569 }
 0x350   :  { %1059 = vperm.xlu0 %1535, %v2012_v0   ;;  %v2032_v3 = vpop.eup %1571 }
 0x351   :  { %v2037_v27 = vpop.eup %1573 }
 0x352   :  { %v2040_v40 = vpop.eup %1575 }
 0x353   :  { %1068 = vperm.xlu1 %1536, %v2014_v48   ;;  %v2043_v37 = vpop.eup %1577 }
 0x354   :  { %1062 = vperm.xlu0 %1535, %v2021_v14   ;;  %v2046_v51 = vpop.eup %1579 }
 0x355   :  { %v2049_v35 = vpop.eup %1581 }
 0x357   :  { %1071 = vperm.xlu1 %1536, %v2023_v13  }
 0x358   :  { %1065 = vperm.xlu0 %1535, %v2030_v22  }
 0x35b   :  { %1074 = vperm.xlu1 %1536, %v2032_v3  }
 0x35f   :  { %1077 = vperm.xlu1 %1536, %v2037_v27  }
 0x363   :  { %1080 = vperm.xlu1 %1536, %v2040_v40  }
 0x367   :  { %1083 = vperm.xlu1 %1536, %v2043_v37  }
 0x36b   :  { %1086 = vperm.xlu1 %1536, %v2046_v51  }
 0x36f   :  { %1089 = vperm.xlu1 %1536, %v2049_v35  }
 0x3c6   :  { %v1045_v62 = vpop.permute.xlu1 %1044 }
 0x3c7   :  { %v1054_v6 = vpop.permute.xlu0 %1053  ;;  %v1094_v24 = vrot.slane %v1045_v62, %v1859_v21 }
 0x3c8   :  { %v1106_v20 = vrot.slane %v1054_v6, %v1859_v21 }
 0x3ca   :  { %v1048_v59 = vpop.permute.xlu1 %1047 }
 0x3cb   :  { %v1098_v2 = vrot.slane %v1048_v59, %v1859_v21  ;;  %v1057_v18 = vpop.permute.xlu0 %1056 }
 0x3cc   :  { %v1110_v36 = vrot.slane %v1057_v18, %v1859_v21 }
 0x3cd   :  { %v1155_v28 = vsel %vm867_vm3, %v1098_v2, %v1094_v24 }
 0x3ce   :  { %v1051_v26 = vpop.permute.xlu1 %1050 }
 0x3cf   :  { %v1102_v19 = vrot.slane %v1051_v26, %v1859_v21  ;;  %v1060_v29 = vpop.permute.xlu0 %1059 }
 0x3d0   :  { %v1114_v31 = vrot.slane %v1060_v29, %v1859_v21 }
 0x3d1   :  { %v1156_v10 = vsel %vm869_vm4, %v1102_v19, %v1155_v28 }
 0x3d2   :  { %v1157_v32 = vsel %vm871_vm5, %v1106_v20, %v1156_v10  ;;  %v1069_v34 = vpop.permute.xlu1 %1068 }
 0x3d3   :  { %v1063_v41 = vpop.permute.xlu0 %1062  ;;  %v1158_v38 = vsel %vm873_vm6, %v1110_v36, %v1157_v32  ;;  %v1126_v5 = vrot.slane %v1069_v34, %v1859_v21 }
 0x3d4   :  { %v1118_v50 = vrot.slane %v1063_v41, %v1859_v21  ;;  %v1159_v39 = vsel %vm875_vm7, %v1114_v31, %v1158_v38 }
 0x3d6   :  { %v1072_v49 = vpop.permute.xlu1 %1071  ;;  %v1160_v46 = vsel %vm877_vm8, %v1118_v50, %v1159_v39 }
 0x3d7   :  { %v1066_v42 = vpop.permute.xlu0 %1065  ;;  %v1130_v1 = vrot.slane %v1072_v49, %v1859_v21 }
 0x3d8   :  { %v1122_v53 = vrot.slane %v1066_v42, %v1859_v21 }
 0x3d9   :  { %v1162_v23 = vsel %vm867_vm3, %v1130_v1, %v1126_v5 }
 0x3da   :  { %v1075_v61 = vpop.permute.xlu1 %1074  ;;  %v1161_v56 = vsel %vm879_vm9, %v1122_v53, %v1160_v46 }
 0x3db   :  { %v1171_v57 = vsel %vm890_vm10, %v1161_v56, 0.0  ;;  %v1134_v4 = vrot.slane %v1075_v61, %v1859_v21 }
 0x3dc   :  { %1172 = vadd.xlane.f32.xlu0 %v1171_v57 }
 0x3dd   :  { %v1163_v33 = vsel %vm869_vm4, %v1134_v4, %v1162_v23 }
 0x3de   :  { %v1078_v60 = vpop.permute.xlu1 %1077 }
 0x3df   :  { %v1138_v15 = vrot.slane %v1078_v60, %v1859_v21 }
 0x3e1   :  { %v1164_v6 = vsel %vm871_vm5, %v1138_v15, %v1163_v33 }
 0x3e2   :  { %v1081_v12 = vpop.permute.xlu1 %1080 }
 0x3e3   :  { %v1142_v16 = vrot.slane %v1081_v12, %v1859_v21 }
 0x3e5   :  { %v1165_v59 = vsel %vm873_vm6, %v1142_v16, %v1164_v6 }
 0x3e6   :  { %v1084_v63 = vpop.permute.xlu1 %1083 }
 0x3e7   :  { %v1146_v47 = vrot.slane %v1084_v63, %v1859_v21 }
 0x3e9   :  { %v1166_v18 = vsel %vm875_vm7, %v1146_v47, %v1165_v59 }
 0x3ea   :  { %v1087_v30 = vpop.permute.xlu1 %1086 }
 0x3eb   :  { %v1150_v62 = vrot.slane %v1087_v30, %v1859_v21 }
 0x3ed   :  { %v1167_v26 = vsel %vm877_vm8, %v1150_v62, %v1166_v18 }
 0x3ee   :  { %v1090_v2 = vpop.permute.xlu1 %1089 }
 0x3ef   :  { %v1154_v24 = vrot.slane %v1090_v2, %v1859_v21 }
 0x3f1   :  { %v1168_v19 = vsel %vm879_vm9, %v1154_v24, %v1167_v26 }
 0x3f2   :  { %v1174_v20 = vsel %vm890_vm10, %v1168_v19, 0.0 }
 0x3f3   :  { %1175 = vadd.xlane.f32.xlu1 %v1174_v20 }
 0x469   :  { %v1173_v28 = vpop.xlane.xlu0 %1172 }
 0x46a   :  { %1583 = vrcp.f32 %v1173_v28 }
 0x474   :  { %v1584_v29 = vpop.eup %1583 }
 0x475   :  { %v1184_v10 = vrot.slane %v1584_v29, %v1720_v45  ;;  %v1188_v32 = vrot.slane %v1584_v29, %v1942_v7  ;;  %v1192_v41 = vrot.slane %v1584_v29, %v1951_v44  ;;  %v1196_v31 = vrot.slane %v1584_v29, %v1945_v8 }
 0x476   :  { %v1200_v39 = vrot.slane %v1584_v29, %v1948_v9  ;;  %v1208_v57 = vrot.slane %v1584_v29, %v1967_v52 }
 0x477   :  { %v1261_v34 = vmul.f32 %v1987_v43, %v1184_v10  ;;  %v1262_v36 = vmul.f32 %v1996_v55, %v1188_v32  ;;  %v1263_v38 = vmul.f32 %v2005_v58, %v1192_v41  ;;  %v1264_v50 = vmul.f32 %v1994_v54, %v1196_v31 }
 0x478   :  { %v1265_v43 = vmul.f32 %v2003_v11, %v1200_v39  ;;  %v1204_v55 = vrot.slane %v1584_v29, %v1957_v17 }
 0x479   :  { %1294 = vperm.xlu0 %1535, %v1261_v34   ;;  %1297 = vperm.xlu1 %1536, %v1262_v36  }
 0x47a   :  { %v1266_v42 = vmul.f32 %v2012_v0, %v1204_v55  ;;  %v1267_v0 = vmul.f32 %v2021_v14, %v1208_v57 }
 0x47d   :  { %1300 = vperm.xlu0 %1535, %v1263_v38  }
 0x480   :  { %v1176_v49 = vpop.xlane.xlu1 %1175 }
 0x481   :  { %1585 = vrcp.f32 %v1176_v49  ;;  %1303 = vperm.xlu0 %1535, %v1264_v50  }
 0x485   :  { %1306 = vperm.xlu0 %1535, %v1265_v43  }
 0x489   :  { %1309 = vperm.xlu0 %1535, %v1266_v42  }
 0x48b   :  { %v1586_v53 = vpop.eup %1585 }
 0x48c   :  { %v1220_v58 = vrot.slane %v1586_v53, %v1942_v7  ;;  %v1216_v61 = vrot.slane %v1586_v53, %v1720_v45  ;;  %v1224_v56 = vrot.slane %v1586_v53, %v1951_v44  ;;  %v1228_v60 = vrot.slane %v1586_v53, %v1945_v8 }
 0x48d   :  { %v1212_v7 = vrot.slane %v1584_v29, %v1975_v25  ;;  %v1232_v44 = vrot.slane %v1586_v53, %v1948_v9  ;;  %v1240_v8 = vrot.slane %v1586_v53, %v1967_v52 }
 0x48e   :  { %v1270_v46 = vmul.f32 %v2023_v13, %v1220_v58  ;;  %v1269_v54 = vmul.f32 %v2014_v48, %v1216_v61  ;;  %v1271_v11 = vmul.f32 %v2032_v3, %v1224_v56  ;;  %v1272_v45 = vmul.f32 %v2037_v27, %v1228_v60 }
 0x48f   :  { %v1268_v48 = vmul.f32 %v2030_v22, %v1212_v7  ;;  %v1273_v13 = vmul.f32 %v2040_v40, %v1232_v44  ;;  %v1236_v3 = vrot.slane %v1586_v53, %v1957_v17  ;;  %v1275_v12 = vmul.f32 %v2046_v51, %v1240_v8 }
 0x490   :  { %1321 = vperm.xlu1 %1536, %v1270_v46   ;;  %1318 = vperm.xlu0 %1535, %v1269_v54   ;;  %v1244_v27 = vrot.slane %v1586_v53, %v1975_v25 }
 0x491   :  { %v1274_v14 = vmul.f32 %v2043_v37, %v1236_v3 }
 0x492   :  { %v1276_v22 = vmul.f32 %v2049_v35, %v1244_v27 }
 0x494   :  { %1324 = vperm.xlu1 %1536, %v1271_v11   ;;  %1312 = vperm.xlu0 %1535, %v1267_v0  }
 0x498   :  { %1327 = vperm.xlu1 %1536, %v1272_v45   ;;  %1315 = vperm.xlu0 %1535, %v1268_v48  }
 0x49c   :  { %1330 = vperm.xlu1 %1536, %v1273_v13  }
 0x4a0   :  { %1333 = vperm.xlu1 %1536, %v1274_v14  }
 0x4a4   :  { %1336 = vperm.xlu1 %1536, %v1275_v12  }
 0x4a8   :  { %1339 = vperm.xlu1 %1536, %v1276_v22  }
 0x4f8   :  { %v1295_v9 = vpop.permute.xlu0 %1294  ;;  %v1298_v4 = vpop.permute.xlu1 %1297 }
 0x4f9   :  { %v1344_v37 = vrot.slane %v1295_v9, %v1859_v21  ;;  %v1348_v52 = vrot.slane %v1298_v4, %v1859_v21 }
 0x4fb   :  { %v1405_v23 = vsel %vm867_vm3, %v1348_v52, %v1344_v37 }
 0x4fc   :  { %v1301_v63 = vpop.permute.xlu0 %1300 }
 0x4fd   :  { %v1352_v51 = vrot.slane %v1301_v63, %v1859_v21 }
 0x4ff   :  { %v1406_v33 = vsel %vm869_vm4, %v1352_v51, %v1405_v23 }
 0x500   :  { %v1304_v1 = vpop.permute.xlu0 %1303 }
 0x501   :  { %v1356_v25 = vrot.slane %v1304_v1, %v1859_v21 }
 0x503   :  { %v1407_v6 = vsel %vm871_vm5, %v1356_v25, %v1406_v33 }
 0x504   :  { %v1307_v40 = vpop.permute.xlu0 %1306 }
 0x505   :  { %v1360_v16 = vrot.slane %v1307_v40, %v1859_v21 }
 0x507   :  { %v1408_v59 = vsel %vm873_vm6, %v1360_v16, %v1407_v6 }
 0x508   :  { %v1310_v17 = vpop.permute.xlu0 %1309 }
 0x509   :  { %v1364_v47 = vrot.slane %v1310_v17, %v1859_v21 }
 0x50b   :  { %v1409_v24 = vsel %vm875_vm7, %v1364_v47, %v1408_v59 }
 0x50f   :  { %v1319_v5 = vpop.permute.xlu0 %1318  ;;  %v1322_v15 = vpop.permute.xlu1 %1321 }
 0x510   :  { %v1376_v10 = vrot.slane %v1319_v5, %v1859_v21  ;;  %v1380_v32 = vrot.slane %v1322_v15, %v1859_v21 }
 0x512   :  { %v1412_v31 = vsel %vm867_vm3, %v1380_v32, %v1376_v10 }
 0x513   :  { %v1313_v35 = vpop.permute.xlu0 %1312  ;;  %v1325_v30 = vpop.permute.xlu1 %1324 }
 0x514   :  { %v1368_v62 = vrot.slane %v1313_v35, %v1859_v21  ;;  %v1384_v34 = vrot.slane %v1325_v30, %v1859_v21 }
 0x516   :  { %v1410_v19 = vsel %vm877_vm8, %v1368_v62, %v1409_v24  ;;  %v1413_v50 = vsel %vm869_vm4, %v1384_v34, %v1412_v31 }
 0x517   :  { %v1316_v2 = vpop.permute.xlu0 %1315  ;;  %v1328_v18 = vpop.permute.xlu1 %1327 }
 0x518   :  { %v1372_v26 = vrot.slane %v1316_v2, %v1859_v21  ;;  %v1388_v36 = vrot.slane %v1328_v18, %v1859_v21 }
 0x51a   :  { %v1411_v20 = vsel %vm879_vm9, %v1372_v26, %v1410_v19  ;;  %v1414_v43 = vsel %vm871_vm5, %v1388_v36, %v1413_v50 }
 0x51b   :  { %1421 = vst.msk [vmem:[%s2164_s10] sm:$0xff] %vm890_vm10, %v1411_v20  ;;  %v1331_v28 = vpop.permute.xlu1 %1330 }
 0x51c   :  { %v1392_v41 = vrot.slane %v1331_v28, %v1859_v21 }
 0x51e   :  { %v1415_v55 = vsel %vm873_vm6, %v1392_v41, %v1414_v43 }
 0x51f   :  { %v1334_v29 = vpop.permute.xlu1 %1333 }
 0x520   :  { %v1396_v49 = vrot.slane %v1334_v29, %v1859_v21 }
 0x522   :  { %v1416_v53 = vsel %vm875_vm7, %v1396_v49, %v1415_v55 }
 0x523   :  { %v1337_v38 = vpop.permute.xlu1 %1336 }
 0x524   :  { %v1400_v39 = vrot.slane %v1337_v38, %v1859_v21 }
 0x526   :  { %v1417_v61 = vsel %vm877_vm8, %v1400_v39, %v1416_v53 }
 0x527   :  { %v1340_v42 = vpop.permute.xlu1 %1339 }
 0x528   :  { %v1404_v58 = vrot.slane %v1340_v42, %v1859_v21 }
 0x52a   :  { %v1418_v46 = vsel %vm879_vm9, %v1404_v58, %v1417_v61 }
 0x52b   :  { %1422 = vst.msk [vmem:[%s2164_s10 + $0x8] sm:$0xff] %vm890_vm10, %v1418_v46 }

</bundles_post_ra>
